<compile_context>
chip_gen: v7x
topology: tpu7x:2x2x1
jax: 0.10.0
libtpu: 0.0.40
codegen_flags: <defaults>
</compile_context>

<pallas_src>
import functools

import jax
import jax.numpy as jnp
from jax.experimental import pallas as pl
from jax.experimental.pallas import tpu as pltpu

MASK_BIAS = -1e30  # finite "minus infinity": exp underflows to 0, never NaN


def _largest_divisor_le(n, cap):
    cap = max(1, min(n, cap))
    for d in range(cap, 0, -1):
        if n % d == 0:
            return d
    return 1


def attention_kernel(h_ref, mb_ref, uvt_ref, uvb_ref, tw_ref, o_ref, *,
                     attn_size, q_tile, use_bf16_tanh, skip_max):
    Bt, S, I = h_ref.shape
    A = attn_size

    h = h_ref[...]                                              # (Bt,S,I) bf16

    # Fused U|V projection: single MXU matmul, bf16 operands, f32 accumulation.
    proj = jnp.dot(h.reshape(Bt * S, I), uvt_ref[...],
                   preferred_element_type=jnp.float32)          # (Bt*S, 2A) f32
    proj = (proj + uvb_ref[...]).reshape(Bt, S, 2 * A)          # u-bias folded (V half = 0)
    xpt = jnp.transpose(proj[:, :, :A], (0, 2, 1))              # key side (U h + b_u)^T (Bt,A,S)
    qp = proj[:, :, A:]                                         # query side  V h        (Bt,S,A)

    mb = mb_ref[...]                                            # (Bt,1,S) mask bias with t_b folded

    # scores[b,i,j] = mb[b,j] + sum_a t[a] * tanh(qp[b,i,a] + xpt[b,a,j])
    # Query-tiled: per query block the accumulator is a small (Bt,tq,S) value that
    # stays in vregs -- no A x VMEM reload/store of an S^2 buffer, footprint O(S*tq).
    n_qblk = S // q_tile
    for qb in range(n_qblk):                                    # static -> unrolled
        q0 = qb * q_tile
        qblk = qp[:, q0:q0 + q_tile, :]                         # (Bt,tq,A)

        acc = None
        # NOTE: for A >= ~32 switch this to lax.fori_loop(..., unroll=8) to bound
        # vreg live ranges; fully static unroll is fine at small A.
        for a in range(A):
            x = qblk[:, :, a:a + 1] + xpt[:, a:a + 1, :]        # (Bt,tq,S) f32
            if use_bf16_tanh:                                   # v6e/v7x EUP bf16 path
                t = jnp.tanh(x.astype(jnp.bfloat16))
            else:                                               # v5e: EUP has no bf16
                t = jnp.tanh(x)
            term = tw_ref[a] * t                                # f32 accumulate
            acc = (mb + term) if acc is None else (acc + term)  # bias folded into init

        scores = acc                                            # (Bt,tq,S)
        if not skip_max:                                        # only when bound not provable
            scores = scores - jnp.max(scores, axis=-1, keepdims=True)
        e = jnp.exp(scores)
        w = e * pl.reciprocal(jnp.sum(e, axis=-1, keepdims=True), approx=True)

        # outputs = weights @ hidden (bf16 operands, f32 accumulation)
        out = jnp.einsum("bij,bjd->bid", w.astype(h.dtype), h,
                         preferred_element_type=jnp.float32)    # (Bt,tq,I)
        o_ref[:, q0:q0 + q_tile, :] = out.astype(o_ref.dtype)


def attention_forward(hidden, mask, u_w, u_b, v_w, t_w, t_b, *,
                      batch_block=None, query_tile=None,
                      vmem_budget_bytes=24 * 2 ** 20):
    """hidden: (B,S,I) f32; mask: (B,S) f32; u_w/v_w: (A,I); u_b: (A,); t_w: (1,A); t_b: (1,)."""
    B, S, I = hidden.shape
    A = u_w.shape[0]

    # ---- tile selection ---------------------------------------------------
    tq = query_tile if query_tile is not None else _largest_divisor_le(S, 32)
    assert S % tq == 0

    def vmem_estimate(bt):
        est = 2 * bt * S * I * 2            # hidden bf16, double-buffered
        est += 2 * bt * S * I * 4           # output f32, double-buffered
        est += 2 * bt * S * 4               # mask bias, double-buffered
        est += I * 2 * A * 2 + 2 * A * 4    # fused weights / bias
        est += 2 * bt * S * 2 * A * 4       # projection + transposed key copy (f32)
        est += bt * S * I * 2               # in-kernel hidden value
        est += 4 * bt * tq * S * 4          # acc / scores / e / w per query block
        return est

    if batch_block is None:
        # aim for >= ~8 grid steps (>= 2 so v7x can shard 'parallel'), under VMEM budget
        bt = _largest_divisor_le(B, max(1, B // 8))
        while bt > 1 and vmem_estimate(bt) > vmem_budget_bytes:
            bt = _largest_divisor_le(B, bt - 1)
    else:
        bt = batch_block
    assert B % bt == 0, "batch_block must divide batch"

    vmem_limit = int(min(max(2 * vmem_estimate(bt), 32 * 2 ** 20), 56 * 2 ** 20))

    # ---- operand prep (no feature padding; bf16 cast halves input DMA) -----
    h_bf16 = hidden.astype(jnp.bfloat16)                                    # (B,S,I)
    uvt = jnp.concatenate([u_w.T, v_w.T], axis=1).astype(jnp.bfloat16)      # (I, 2A)
    uvb = jnp.concatenate([u_b.astype(jnp.float32),
                           jnp.zeros((A,), jnp.float32)]).reshape(1, 2 * A)
    tb = jnp.asarray(t_b, jnp.float32).reshape(())
    # additive key mask bias with t_b folded in: t_b keep / -1e30 drop
    mbias = (jnp.where(mask >= 1.0, 0.0, MASK_BIAS).astype(jnp.float32) + tb)[:, None, :]
    tw = t_w.reshape(A).astype(jnp.float32)

    # scores are bounded by ||t_w||_1 + |t_b| (tanh in [-1,1]); if that bound is
    # provably small, skip the softmax row-max subtraction (saves an XLU row reduce
    # plus a full (Bt,tq,S) subtract per block). Falls back to the safe path when
    # parameters are traced.
    try:
        bound = float(jnp.sum(jnp.abs(tw)) + jnp.abs(tb))
        skip_max = bound < 60.0
    except Exception:
        skip_max = False

    kind = jax.devices()[0].device_kind.lower()
    use_bf16_tanh = ("v6" in kind) or ("v7" in kind) or ("7x" in kind)  # not on v5e/older

    kernel = functools.partial(attention_kernel, attn_size=A, q_tile=tq,
                               use_bf16_tanh=use_bf16_tanh, skip_max=skip_max)

    cost = pl.CostEstimate(
        flops=int(2 * B * S * I * 2 * A     # fused U|V projection
                  + 3 * B * S * S * A       # score FMA passes
                  + 2 * B * S * S * I       # AV matmul
                  + 5 * B * S * S),         # softmax arithmetic
        transcendentals=int(B * S * S * (A + 1)),   # tanh + exp (the real bottleneck)
        bytes_accessed=int(B * S * I * 2 + B * S * 4 + I * 2 * A * 2
                           + 2 * A * 4 + A * 4 + B * S * I * 4),
    )

    return pl.pallas_call(
        kernel,
        out_shape=jax.ShapeDtypeStruct((B, S, I), jnp.float32),
        grid_spec=pltpu.PrefetchScalarGridSpec(
            num_scalar_prefetch=0,
            grid=(B // bt,),
            in_specs=[
                pl.BlockSpec((bt, S, I), lambda b: (b, 0, 0)),        # hidden (bf16)
                pl.BlockSpec((bt, 1, S), lambda b: (b, 0, 0)),        # mask bias + t_b (f32)
                pl.BlockSpec((I, 2 * A), lambda b: (0, 0)),           # fused U|V weight (bf16)
                pl.BlockSpec((1, 2 * A), lambda b: (0, 0)),           # fused u-bias (f32)
                pl.BlockSpec(memory_space=pltpu.MemorySpace.SMEM),    # t weight scalars (A,)
            ],
            out_specs=pl.BlockSpec((bt, S, I), lambda b: (b, 0, 0)),  # unpadded output
        ),
        compiler_params=pltpu.CompilerParams(
            dimension_semantics=("parallel",),
            vmem_limit_bytes=vmem_limit,
        ),
        cost_estimate=cost,
    )(h_bf16, mbias, uvt, uvb, tw)


def reference(hidden, mask, u_w, u_b, v_w, t_w, t_b):
    """Pure-JAX (f32) mirror of the PyTorch forward (for validation)."""
    B, S, I = hidden.shape
    A = u_w.shape[0]
    xp = hidden @ u_w.T + u_b                                  # (B,S,A) key-side
    qp = hidden @ v_w.T                                        # (B,S,A) query-side
    s = jnp.tanh(xp[:, None, :, :] + qp[:, :, None, :])        # (B,S,S,A)
    scores = jnp.einsum("bija,a->bij", s, t_w.reshape(A)) + t_b.reshape(())
    key_mask = (mask < 1.0)[:, None, :]
    scores = jnp.where(key_mask, -jnp.inf, scores)
    w = jax.nn.softmax(scores, axis=-1)
    return jnp.einsum("bij,bjd->bid", w, hidden)


if __name__ == "__main__":
    B, S, I, A = 2, 8, 32, 16   # batch, seq_len, input_size, attn_size

    key = jax.random.PRNGKey(0)
    k1, k2, k3, k4, k5, k6 = jax.random.split(key, 6)

    hidden = jax.random.normal(k1, (B, S, I), jnp.float32)
    mask = (jax.random.uniform(k2, (B, S)) > 0.3).astype(jnp.float32)
    mask = mask.at[:, 0].set(1.0)   # at least one unmasked key per batch row
    # NOTE: rows with ALL keys masked would give NaN (like the reference's all -inf
    # softmax); the test guarantees at least one valid key per row.

    # Deterministic parameter init. The PyTorch module zero-inits tlinear.weight
    # (which would make scores constant); small random values exercise the hot path.
    u_w = jax.random.normal(k3, (A, I), jnp.float32) * 0.1
    u_b = jax.random.normal(k4, (A,), jnp.float32) * 0.1
    v_w = jax.random.normal(k5, (A, I), jnp.float32) * 0.1
    t_w = jax.random.normal(k6, (1, A), jnp.float32) * 0.1
    t_b = jnp.full((1,), 0.05, jnp.float32)

    out = attention_forward(hidden, mask, u_w, u_b, v_w, t_w, t_b)
    jax.block_until_ready(out)

    ref = reference(hidden, mask, u_w, u_b, v_w, t_w, t_b)
    assert out.shape == (B, S, I)
    # Tolerance loosened vs the pure-f32 reference because matmul operands (and the
    # tanh on v6e/v7x) are bf16 with f32 accumulation; logic errors would show up as
    # O(1) mismatches.
    assert jnp.allclose(out, ref, atol=5e-2, rtol=5e-2), "Pallas kernel mismatch vs JAX reference"

    print("KERNEL_OK")
</pallas_src>

<mosaic_0001>
module attributes {stable_mosaic.version = 11 : i64} {
  func.func @attention_kernel(%arg0: i32, %arg1: memref<1x8x32xbf16, #tpu.memory_space<vmem>>, %arg2: memref<1x1x8xf32, #tpu.memory_space<vmem>>, %arg3: memref<32x32xbf16, #tpu.memory_space<vmem>>, %arg4: memref<1x32xf32, #tpu.memory_space<vmem>>, %arg5: memref<16xf32, #tpu.memory_space<smem>>, %arg6: memref<1x8x32xf32, #tpu.memory_space<vmem>>) attributes {dimension_semantics = [#tpu.dimension_semantics<parallel>], iteration_bounds = array<i64: 2>, scalar_prefetch = 0 : i64, scratch_operands = 0 : i64, tpu.core_type = #tpu.core_type<tc>, window_params = [{transform_indices = @transform_0, window_bounds = array<i64: 1, 8, 32>}, {transform_indices = @transform_1, window_bounds = array<i64: 1, 1, 8>}, {pipeline_mode = #tpu.pipeline_mode<synchronous>, transform_indices = @transform_2, window_bounds = array<i64: 32, 32>}, {pipeline_mode = #tpu.pipeline_mode<synchronous>, transform_indices = @transform_3, window_bounds = array<i64: 1, 32>}, {transform_indices = @transform_4, window_bounds = array<i64: 16>}, {transform_indices = @transform_5, window_bounds = array<i64: 1, 8, 32>}]} {
    %c0 = arith.constant 0 : index
    %c0_0 = arith.constant 0 : index
    %c0_1 = arith.constant 0 : index
    %0 = vector.load %arg1[%c0, %c0_0, %c0_1] : memref<1x8x32xbf16, #tpu.memory_space<vmem>>, vector<1x8x32xbf16>
    %1 = vector.shape_cast %0 : vector<1x8x32xbf16> to vector<8x32xbf16>
    %c0_2 = arith.constant 0 : index
    %c0_3 = arith.constant 0 : index
    %2 = vector.load %arg3[%c0_2, %c0_3] : memref<32x32xbf16, #tpu.memory_space<vmem>>, vector<32x32xbf16>
    %cst = arith.constant dense<0.000000e+00> : vector<8x32xf32>
    %3 = tpu.matmul %1, %2, %cst {dimension_numbers = #tpu.dot_dimension_numbers<[1], [0], [0], [1], [0, 0, 1, 1], [], []>} : vector<8x32xbf16>, vector<32x32xbf16>, vector<8x32xf32> -> vector<8x32xf32>
    %c0_4 = arith.constant 0 : index
    %c0_5 = arith.constant 0 : index
    %4 = vector.load %arg4[%c0_4, %c0_5] : memref<1x32xf32, #tpu.memory_space<vmem>>, vector<1x32xf32>
    %5 = vector.broadcast %4 : vector<1x32xf32> to vector<8x32xf32>
    %6 = arith.addf %3, %5 : vector<8x32xf32>
    %7 = vector.shape_cast %6 : vector<8x32xf32> to vector<1x8x32xf32>
    %8 = vector.extract_strided_slice %7 {offsets = [0, 0, 0], sizes = [1, 8, 16], strides = [1, 1, 1]} : vector<1x8x32xf32> to vector<1x8x16xf32>
    %9 = tpu.transpose %8, [0, 2, 1] : vector<1x8x16xf32> -> vector<1x16x8xf32>
    %10 = vector.extract_strided_slice %7 {offsets = [0, 0, 16], sizes = [1, 8, 16], strides = [1, 1, 1]} : vector<1x8x32xf32> to vector<1x8x16xf32>
    %c0_6 = arith.constant 0 : index
    %c0_7 = arith.constant 0 : index
    %c0_8 = arith.constant 0 : index
    %11 = vector.load %arg2[%c0_6, %c0_7, %c0_8] : memref<1x1x8xf32, #tpu.memory_space<vmem>>, vector<1x1x8xf32>
    %12 = vector.extract_strided_slice %10 {offsets = [0, 0, 0], sizes = [1, 8, 1], strides = [1, 1, 1]} : vector<1x8x16xf32> to vector<1x8x1xf32>
    %13 = vector.extract_strided_slice %9 {offsets = [0, 0, 0], sizes = [1, 1, 8], strides = [1, 1, 1]} : vector<1x16x8xf32> to vector<1x1x8xf32>
    %14 = vector.broadcast %12 : vector<1x8x1xf32> to vector<1x8x8xf32>
    %15 = vector.broadcast %13 : vector<1x1x8xf32> to vector<1x8x8xf32>
    %16 = arith.addf %14, %15 : vector<1x8x8xf32>
    %17 = math.tanh %16 : vector<1x8x8xf32>
    %c0_9 = arith.constant 0 : index
    %18 = memref.load %arg5[%c0_9] : memref<16xf32, #tpu.memory_space<smem>>
    %19 = vector.broadcast %18 : f32 to vector<1x8x8xf32>
    %20 = arith.mulf %19, %17 : vector<1x8x8xf32>
    %21 = vector.broadcast %11 : vector<1x1x8xf32> to vector<1x8x8xf32>
    %22 = arith.addf %21, %20 : vector<1x8x8xf32>
    %23 = vector.extract_strided_slice %10 {offsets = [0, 0, 1], sizes = [1, 8, 1], strides = [1, 1, 1]} : vector<1x8x16xf32> to vector<1x8x1xf32>
    %24 = vector.extract_strided_slice %9 {offsets = [0, 1, 0], sizes = [1, 1, 8], strides = [1, 1, 1]} : vector<1x16x8xf32> to vector<1x1x8xf32>
    %25 = vector.broadcast %23 : vector<1x8x1xf32> to vector<1x8x8xf32>
    %26 = vector.broadcast %24 : vector<1x1x8xf32> to vector<1x8x8xf32>
    %27 = arith.addf %25, %26 : vector<1x8x8xf32>
    %28 = math.tanh %27 : vector<1x8x8xf32>
    %c1 = arith.constant 1 : index
    %29 = memref.load %arg5[%c1] : memref<16xf32, #tpu.memory_space<smem>>
    %30 = vector.broadcast %29 : f32 to vector<1x8x8xf32>
    %31 = arith.mulf %30, %28 : vector<1x8x8xf32>
    %32 = arith.addf %22, %31 : vector<1x8x8xf32>
    %33 = vector.extract_strided_slice %10 {offsets = [0, 0, 2], sizes = [1, 8, 1], strides = [1, 1, 1]} : vector<1x8x16xf32> to vector<1x8x1xf32>
    %34 = vector.extract_strided_slice %9 {offsets = [0, 2, 0], sizes = [1, 1, 8], strides = [1, 1, 1]} : vector<1x16x8xf32> to vector<1x1x8xf32>
    %35 = vector.broadcast %33 : vector<1x8x1xf32> to vector<1x8x8xf32>
    %36 = vector.broadcast %34 : vector<1x1x8xf32> to vector<1x8x8xf32>
    %37 = arith.addf %35, %36 : vector<1x8x8xf32>
    %38 = math.tanh %37 : vector<1x8x8xf32>
    %c2 = arith.constant 2 : index
    %39 = memref.load %arg5[%c2] : memref<16xf32, #tpu.memory_space<smem>>
    %40 = vector.broadcast %39 : f32 to vector<1x8x8xf32>
    %41 = arith.mulf %40, %38 : vector<1x8x8xf32>
    %42 = arith.addf %32, %41 : vector<1x8x8xf32>
    %43 = vector.extract_strided_slice %10 {offsets = [0, 0, 3], sizes = [1, 8, 1], strides = [1, 1, 1]} : vector<1x8x16xf32> to vector<1x8x1xf32>
    %44 = vector.extract_strided_slice %9 {offsets = [0, 3, 0], sizes = [1, 1, 8], strides = [1, 1, 1]} : vector<1x16x8xf32> to vector<1x1x8xf32>
    %45 = vector.broadcast %43 : vector<1x8x1xf32> to vector<1x8x8xf32>
    %46 = vector.broadcast %44 : vector<1x1x8xf32> to vector<1x8x8xf32>
    %47 = arith.addf %45, %46 : vector<1x8x8xf32>
    %48 = math.tanh %47 : vector<1x8x8xf32>
    %c3 = arith.constant 3 : index
    %49 = memref.load %arg5[%c3] : memref<16xf32, #tpu.memory_space<smem>>
    %50 = vector.broadcast %49 : f32 to vector<1x8x8xf32>
    %51 = arith.mulf %50, %48 : vector<1x8x8xf32>
    %52 = arith.addf %42, %51 : vector<1x8x8xf32>
    %53 = vector.extract_strided_slice %10 {offsets = [0, 0, 4], sizes = [1, 8, 1], strides = [1, 1, 1]} : vector<1x8x16xf32> to vector<1x8x1xf32>
    %54 = vector.extract_strided_slice %9 {offsets = [0, 4, 0], sizes = [1, 1, 8], strides = [1, 1, 1]} : vector<1x16x8xf32> to vector<1x1x8xf32>
    %55 = vector.broadcast %53 : vector<1x8x1xf32> to vector<1x8x8xf32>
    %56 = vector.broadcast %54 : vector<1x1x8xf32> to vector<1x8x8xf32>
    %57 = arith.addf %55, %56 : vector<1x8x8xf32>
    %58 = math.tanh %57 : vector<1x8x8xf32>
    %c4 = arith.constant 4 : index
    %59 = memref.load %arg5[%c4] : memref<16xf32, #tpu.memory_space<smem>>
    %60 = vector.broadcast %59 : f32 to vector<1x8x8xf32>
    %61 = arith.mulf %60, %58 : vector<1x8x8xf32>
    %62 = arith.addf %52, %61 : vector<1x8x8xf32>
    %63 = vector.extract_strided_slice %10 {offsets = [0, 0, 5], sizes = [1, 8, 1], strides = [1, 1, 1]} : vector<1x8x16xf32> to vector<1x8x1xf32>
    %64 = vector.extract_strided_slice %9 {offsets = [0, 5, 0], sizes = [1, 1, 8], strides = [1, 1, 1]} : vector<1x16x8xf32> to vector<1x1x8xf32>
    %65 = vector.broadcast %63 : vector<1x8x1xf32> to vector<1x8x8xf32>
    %66 = vector.broadcast %64 : vector<1x1x8xf32> to vector<1x8x8xf32>
    %67 = arith.addf %65, %66 : vector<1x8x8xf32>
    %68 = math.tanh %67 : vector<1x8x8xf32>
    %c5 = arith.constant 5 : index
    %69 = memref.load %arg5[%c5] : memref<16xf32, #tpu.memory_space<smem>>
    %70 = vector.broadcast %69 : f32 to vector<1x8x8xf32>
    %71 = arith.mulf %70, %68 : vector<1x8x8xf32>
    %72 = arith.addf %62, %71 : vector<1x8x8xf32>
    %73 = vector.extract_strided_slice %10 {offsets = [0, 0, 6], sizes = [1, 8, 1], strides = [1, 1, 1]} : vector<1x8x16xf32> to vector<1x8x1xf32>
    %74 = vector.extract_strided_slice %9 {offsets = [0, 6, 0], sizes = [1, 1, 8], strides = [1, 1, 1]} : vector<1x16x8xf32> to vector<1x1x8xf32>
    %75 = vector.broadcast %73 : vector<1x8x1xf32> to vector<1x8x8xf32>
    %76 = vector.broadcast %74 : vector<1x1x8xf32> to vector<1x8x8xf32>
    %77 = arith.addf %75, %76 : vector<1x8x8xf32>
    %78 = math.tanh %77 : vector<1x8x8xf32>
    %c6 = arith.constant 6 : index
    %79 = memref.load %arg5[%c6] : memref<16xf32, #tpu.memory_space<smem>>
    %80 = vector.broadcast %79 : f32 to vector<1x8x8xf32>
    %81 = arith.mulf %80, %78 : vector<1x8x8xf32>
    %82 = arith.addf %72, %81 : vector<1x8x8xf32>
    %83 = vector.extract_strided_slice %10 {offsets = [0, 0, 7], sizes = [1, 8, 1], strides = [1, 1, 1]} : vector<1x8x16xf32> to vector<1x8x1xf32>
    %84 = vector.extract_strided_slice %9 {offsets = [0, 7, 0], sizes = [1, 1, 8], strides = [1, 1, 1]} : vector<1x16x8xf32> to vector<1x1x8xf32>
    %85 = vector.broadcast %83 : vector<1x8x1xf32> to vector<1x8x8xf32>
    %86 = vector.broadcast %84 : vector<1x1x8xf32> to vector<1x8x8xf32>
    %87 = arith.addf %85, %86 : vector<1x8x8xf32>
    %88 = math.tanh %87 : vector<1x8x8xf32>
    %c7 = arith.constant 7 : index
    %89 = memref.load %arg5[%c7] : memref<16xf32, #tpu.memory_space<smem>>
    %90 = vector.broadcast %89 : f32 to vector<1x8x8xf32>
    %91 = arith.mulf %90, %88 : vector<1x8x8xf32>
    %92 = arith.addf %82, %91 : vector<1x8x8xf32>
    %93 = vector.extract_strided_slice %10 {offsets = [0, 0, 8], sizes = [1, 8, 1], strides = [1, 1, 1]} : vector<1x8x16xf32> to vector<1x8x1xf32>
    %94 = vector.extract_strided_slice %9 {offsets = [0, 8, 0], sizes = [1, 1, 8], strides = [1, 1, 1]} : vector<1x16x8xf32> to vector<1x1x8xf32>
    %95 = vector.broadcast %93 : vector<1x8x1xf32> to vector<1x8x8xf32>
    %96 = vector.broadcast %94 : vector<1x1x8xf32> to vector<1x8x8xf32>
    %97 = arith.addf %95, %96 : vector<1x8x8xf32>
    %98 = math.tanh %97 : vector<1x8x8xf32>
    %c8 = arith.constant 8 : index
    %99 = memref.load %arg5[%c8] : memref<16xf32, #tpu.memory_space<smem>>
    %100 = vector.broadcast %99 : f32 to vector<1x8x8xf32>
    %101 = arith.mulf %100, %98 : vector<1x8x8xf32>
    %102 = arith.addf %92, %101 : vector<1x8x8xf32>
    %103 = vector.extract_strided_slice %10 {offsets = [0, 0, 9], sizes = [1, 8, 1], strides = [1, 1, 1]} : vector<1x8x16xf32> to vector<1x8x1xf32>
    %104 = vector.extract_strided_slice %9 {offsets = [0, 9, 0], sizes = [1, 1, 8], strides = [1, 1, 1]} : vector<1x16x8xf32> to vector<1x1x8xf32>
    %105 = vector.broadcast %103 : vector<1x8x1xf32> to vector<1x8x8xf32>
    %106 = vector.broadcast %104 : vector<1x1x8xf32> to vector<1x8x8xf32>
    %107 = arith.addf %105, %106 : vector<1x8x8xf32>
    %108 = math.tanh %107 : vector<1x8x8xf32>
    %c9 = arith.constant 9 : index
    %109 = memref.load %arg5[%c9] : memref<16xf32, #tpu.memory_space<smem>>
    %110 = vector.broadcast %109 : f32 to vector<1x8x8xf32>
    %111 = arith.mulf %110, %108 : vector<1x8x8xf32>
    %112 = arith.addf %102, %111 : vector<1x8x8xf32>
    %113 = vector.extract_strided_slice %10 {offsets = [0, 0, 10], sizes = [1, 8, 1], strides = [1, 1, 1]} : vector<1x8x16xf32> to vector<1x8x1xf32>
    %114 = vector.extract_strided_slice %9 {offsets = [0, 10, 0], sizes = [1, 1, 8], strides = [1, 1, 1]} : vector<1x16x8xf32> to vector<1x1x8xf32>
    %115 = vector.broadcast %113 : vector<1x8x1xf32> to vector<1x8x8xf32>
    %116 = vector.broadcast %114 : vector<1x1x8xf32> to vector<1x8x8xf32>
    %117 = arith.addf %115, %116 : vector<1x8x8xf32>
    %118 = math.tanh %117 : vector<1x8x8xf32>
    %c10 = arith.constant 10 : index
    %119 = memref.load %arg5[%c10] : memref<16xf32, #tpu.memory_space<smem>>
    %120 = vector.broadcast %119 : f32 to vector<1x8x8xf32>
    %121 = arith.mulf %120, %118 : vector<1x8x8xf32>
    %122 = arith.addf %112, %121 : vector<1x8x8xf32>
    %123 = vector.extract_strided_slice %10 {offsets = [0, 0, 11], sizes = [1, 8, 1], strides = [1, 1, 1]} : vector<1x8x16xf32> to vector<1x8x1xf32>
    %124 = vector.extract_strided_slice %9 {offsets = [0, 11, 0], sizes = [1, 1, 8], strides = [1, 1, 1]} : vector<1x16x8xf32> to vector<1x1x8xf32>
    %125 = vector.broadcast %123 : vector<1x8x1xf32> to vector<1x8x8xf32>
    %126 = vector.broadcast %124 : vector<1x1x8xf32> to vector<1x8x8xf32>
    %127 = arith.addf %125, %126 : vector<1x8x8xf32>
    %128 = math.tanh %127 : vector<1x8x8xf32>
    %c11 = arith.constant 11 : index
    %129 = memref.load %arg5[%c11] : memref<16xf32, #tpu.memory_space<smem>>
    %130 = vector.broadcast %129 : f32 to vector<1x8x8xf32>
    %131 = arith.mulf %130, %128 : vector<1x8x8xf32>
    %132 = arith.addf %122, %131 : vector<1x8x8xf32>
    %133 = vector.extract_strided_slice %10 {offsets = [0, 0, 12], sizes = [1, 8, 1], strides = [1, 1, 1]} : vector<1x8x16xf32> to vector<1x8x1xf32>
    %134 = vector.extract_strided_slice %9 {offsets = [0, 12, 0], sizes = [1, 1, 8], strides = [1, 1, 1]} : vector<1x16x8xf32> to vector<1x1x8xf32>
    %135 = vector.broadcast %133 : vector<1x8x1xf32> to vector<1x8x8xf32>
    %136 = vector.broadcast %134 : vector<1x1x8xf32> to vector<1x8x8xf32>
    %137 = arith.addf %135, %136 : vector<1x8x8xf32>
    %138 = math.tanh %137 : vector<1x8x8xf32>
    %c12 = arith.constant 12 : index
    %139 = memref.load %arg5[%c12] : memref<16xf32, #tpu.memory_space<smem>>
    %140 = vector.broadcast %139 : f32 to vector<1x8x8xf32>
    %141 = arith.mulf %140, %138 : vector<1x8x8xf32>
    %142 = arith.addf %132, %141 : vector<1x8x8xf32>
    %143 = vector.extract_strided_slice %10 {offsets = [0, 0, 13], sizes = [1, 8, 1], strides = [1, 1, 1]} : vector<1x8x16xf32> to vector<1x8x1xf32>
    %144 = vector.extract_strided_slice %9 {offsets = [0, 13, 0], sizes = [1, 1, 8], strides = [1, 1, 1]} : vector<1x16x8xf32> to vector<1x1x8xf32>
    %145 = vector.broadcast %143 : vector<1x8x1xf32> to vector<1x8x8xf32>
    %146 = vector.broadcast %144 : vector<1x1x8xf32> to vector<1x8x8xf32>
    %147 = arith.addf %145, %146 : vector<1x8x8xf32>
    %148 = math.tanh %147 : vector<1x8x8xf32>
    %c13 = arith.constant 13 : index
    %149 = memref.load %arg5[%c13] : memref<16xf32, #tpu.memory_space<smem>>
    %150 = vector.broadcast %149 : f32 to vector<1x8x8xf32>
    %151 = arith.mulf %150, %148 : vector<1x8x8xf32>
    %152 = arith.addf %142, %151 : vector<1x8x8xf32>
    %153 = vector.extract_strided_slice %10 {offsets = [0, 0, 14], sizes = [1, 8, 1], strides = [1, 1, 1]} : vector<1x8x16xf32> to vector<1x8x1xf32>
    %154 = vector.extract_strided_slice %9 {offsets = [0, 14, 0], sizes = [1, 1, 8], strides = [1, 1, 1]} : vector<1x16x8xf32> to vector<1x1x8xf32>
    %155 = vector.broadcast %153 : vector<1x8x1xf32> to vector<1x8x8xf32>
    %156 = vector.broadcast %154 : vector<1x1x8xf32> to vector<1x8x8xf32>
    %157 = arith.addf %155, %156 : vector<1x8x8xf32>
    %158 = math.tanh %157 : vector<1x8x8xf32>
    %c14 = arith.constant 14 : index
    %159 = memref.load %arg5[%c14] : memref<16xf32, #tpu.memory_space<smem>>
    %160 = vector.broadcast %159 : f32 to vector<1x8x8xf32>
    %161 = arith.mulf %160, %158 : vector<1x8x8xf32>
    %162 = arith.addf %152, %161 : vector<1x8x8xf32>
    %163 = vector.extract_strided_slice %10 {offsets = [0, 0, 15], sizes = [1, 8, 1], strides = [1, 1, 1]} : vector<1x8x16xf32> to vector<1x8x1xf32>
    %164 = vector.extract_strided_slice %9 {offsets = [0, 15, 0], sizes = [1, 1, 8], strides = [1, 1, 1]} : vector<1x16x8xf32> to vector<1x1x8xf32>
    %165 = vector.broadcast %163 : vector<1x8x1xf32> to vector<1x8x8xf32>
    %166 = vector.broadcast %164 : vector<1x1x8xf32> to vector<1x8x8xf32>
    %167 = arith.addf %165, %166 : vector<1x8x8xf32>
    %168 = math.tanh %167 : vector<1x8x8xf32>
    %c15 = arith.constant 15 : index
    %169 = memref.load %arg5[%c15] : memref<16xf32, #tpu.memory_space<smem>>
    %170 = vector.broadcast %169 : f32 to vector<1x8x8xf32>
    %171 = arith.mulf %170, %168 : vector<1x8x8xf32>
    %172 = arith.addf %162, %171 : vector<1x8x8xf32>
    %173 = math.exp %172 : vector<1x8x8xf32>
    %cst_10 = arith.constant dense<0.000000e+00> : vector<1x8xf32>
    %174 = vector.multi_reduction <add>, %173, %cst_10 [2] : vector<1x8x8xf32> to vector<1x8xf32>
    %175 = vector.shape_cast %174 : vector<1x8xf32> to vector<1x8x1xf32>
    %176 = tpu.reciprocal %175 {approx = true} : vector<1x8x1xf32> -> vector<1x8x1xf32>
    %177 = vector.broadcast %176 : vector<1x8x1xf32> to vector<1x8x8xf32>
    %178 = arith.mulf %173, %177 : vector<1x8x8xf32>
    %179 = arith.truncf %178 : vector<1x8x8xf32> to vector<1x8x8xbf16>
    "tpu.trace_start"() <{level = 10 : i32, message = "bij,bjd->bid"}> : () -> ()
    %cst_11 = arith.constant dense<0.000000e+00> : vector<1x8x32xf32>
    %180 = tpu.matmul %179, %0, %cst_11 {dimension_numbers = #tpu.dot_dimension_numbers<[2], [1], [1], [2], [0, 0, 0, 1, 1, 2], [0], [0]>} : vector<1x8x8xbf16>, vector<1x8x32xbf16>, vector<1x8x32xf32> -> vector<1x8x32xf32>
    "tpu.trace_stop"() : () -> ()
    %c0_12 = arith.constant 0 : index
    %c0_13 = arith.constant 0 : index
    %c0_14 = arith.constant 0 : index
    %181 = vector.load %arg6[%c0_12, %c0_13, %c0_14] : memref<1x8x32xf32, #tpu.memory_space<vmem>>, vector<1x8x32xf32>
    tpu.vector_store %arg6[%c0_12, %c0_13, %c0_14], %180 {strides = array<i32>} : memref<1x8x32xf32, #tpu.memory_space<vmem>>, vector<1x8x32xf32>,
    return
  }
  func.func @transform_0(%arg0: i32) -> (i32, i32, i32) {
    %c0_i32 = arith.constant 0 : i32
    %c0_i32_0 = arith.constant 0 : i32
    %c0_i32_1 = arith.constant 0 : i32
    return %arg0, %c0_i32, %c0_i32_0 : i32, i32, i32
  }
  func.func @transform_1(%arg0: i32) -> (i32, i32, i32) {
    %c0_i32 = arith.constant 0 : i32
    %c0_i32_0 = arith.constant 0 : i32
    %c0_i32_1 = arith.constant 0 : i32
    return %arg0, %c0_i32, %c0_i32_0 : i32, i32, i32
  }
  func.func @transform_2(%arg0: i32) -> (i32, i32) {
    %c0_i32 = arith.constant 0 : i32
    %c0_i32_0 = arith.constant 0 : i32
    %c0_i32_1 = arith.constant 0 : i32
    return %c0_i32, %c0_i32_0 : i32, i32
  }
  func.func @transform_3(%arg0: i32) -> (i32, i32) {
    %c0_i32 = arith.constant 0 : i32
    %c0_i32_0 = arith.constant 0 : i32
    %c0_i32_1 = arith.constant 0 : i32
    return %c0_i32, %c0_i32_0 : i32, i32
  }
  func.func @transform_4(%arg0: i32) -> i32 {
    %c0_i32 = arith.constant 0 : i32
    %c0_i32_0 = arith.constant 0 : i32
    return %c0_i32 : i32
  }
  func.func @transform_5(%arg0: i32) -> (i32, i32, i32) {
    %c0_i32 = arith.constant 0 : i32
    %c0_i32_0 = arith.constant 0 : i32
    %c0_i32_1 = arith.constant 0 : i32
    return %arg0, %c0_i32, %c0_i32_0 : i32, i32, i32
  }
}

</mosaic_0001>

<bundles_post_ra>
// kernel: tpu_custom_call.1
= control target key start
LH: loop header
LB: loop body
LE: loop exit
PB: predicated region body
PF: predicated region fallthrough
CT: control target
= control target key end

     0   :  { %10 = vsyncpa [#allocation3], 0  ;;  %s1492_s0 = inlined_call_operand.hbm [shape: bf16[2,8,32], index: 0, kind: input, shape index: {}]   ;;  %s1493_s1 = inlined_call_operand.vmem [shape: f32[2,1,8], index: 1, kind: input, shape index: {}]   ;;  %s1494_s2 = inlined_call_operand.hbm [shape: bf16[32,32], index: 2, kind: input, shape index: {}]   ;;  %s1495_s3 = inlined_call_operand.vmem [shape: f32[1,32], index: 3, kind: input, shape index: {}]   ;;  %s1496_s4 = inlined_call_operand.vmem [shape: f32[16], index: 4, kind: input, shape index: {}]   ;;  %s1497_s5 = inlined_call_operand.hbm [shape: f32[2,8,32], index: 5, kind: output, shape index: {}]  }
   0x1   :  { %12 = vsyncpa [#allocation3 + $0x1], 0 }
   0x2   :  { %13 = vsyncpa [#allocation7], 0 }
   0x3   :  { %14 = vsyncpa [#allocation5], 0 }
   0x4   :  { %15 = vsyncpa [#allocation4], 0 }
   0x5   :  { %17 = vsyncpa [#allocation4 + $0x1], 0  ;;  %s1188_s18 = smov 0   ;;  %s1190_s19 = smov 0  }
   0x6   :  { %s1192_s20 = smov 0   ;;  %s1194_s21 = smov 0  }
   0x7 LB: > { %s1209_s22 = sadd.s32 4294967295, %s1132_s21   ;;  %s787_s23 = sadd.s32 4294967294, %s1132_s21   ;;  %s1132_s21 = sphi %s1194_s21, %s1519_s21   ;;  %s1128_s20 = sphi %s1192_s20, %s1518_s20   ;;  %s1124_s19 = sphi %s1190_s19, %s1517_s19   ;;  %s1120_s18 = sphi %s1188_s18, %s1516_s18  }
   0x8   : > { %p43_p0 = scmp.ne.s32.totalorder %s1124_s19, %s1120_s18  ;;  %p1498_p1 = scmp.eq.s32.totalorder %s1209_s22, 0 }
   0x9   : > { %p162_p3 = scmp.eq.s32.totalorder %s787_s23, 1  ;;  %p788_p5 = scmp.ge.s32.totalorder %s1132_s21, 1 }
   0xa   : > { %p1218_p4 = por %p1498_p1, %p43_p0  ;;  %p169_p7 = scmp.lt.s32.totalorder %s1132_s21, 3 }
   0xb   : > { %p1223_p6 = por %p162_p3, %p43_p0  ;;  %s1134_s27 = smov [#allocation6]  }
   0xc   : > { %s1501_s24 = scalar_select %p1218_p4, 1, 0 }
   0xd   : > { %s1502_s25 = scalar_select %p1223_p6, 1, 0 }
   0xe   : > { %p1228_p8 = pnand %p788_p5, %p169_p7  ;;  %s181_s28 = sshll.u32 %s1134_s27, 4  ;;  %s182_s28 = int_to_ptr.vmem [resolvable:$true] %s181_s28 }
   0xf   : > { %s198_s6 = sshll.u32 %s1496_s4, 4  ;;  %s985_s10 = scalar_lea.hbm %s1494_s2, 256  ;;  %s1244_s6 = int_to_ptr.vmem [resolvable:$true] %s198_s6 }
  0x10   : > { %s1503_s26 = scalar_select %p1228_p8, 1, 0 }
  0x11   : > { %p855_p9 = pneg %p1228_p8  ;;  %p986_p12 = scmp.ne.s32.totalorder %s1494_s2, %s985_s10 }
  0x12   : > { %p992_p5 = scmp.lt.u32.totalorder %s985_s10, %s1494_s2 }
  0x13   : > { %p1240_p11 = pnand %p855_p9, %p1498_p1 }
  0x15   : > { %p987_p13 = pneg %p1240_p11 }
  0x17   : > { %p988_p0 = pnand %p987_p13, %p986_p12 }
  0x19   : > { %p989_p3 = pneg %p988_p0 }
  0x1b   : > { %p994_p7 = pnand %p992_p5, %p989_p3 }
  0x1d   : > { %997 = shalt.err (!%p994_p7)
}
  0x1e   : > { %s998_s15 = scalar_lea.vmem %s182_s28, 256  ;;  %p1006_p2 = scmp.lt.s32.totalorder %s182_s28, %s182_s28 }
  0x1f   : > { %p999_p9 = scmp.ne.s32.totalorder %s182_s28, %s998_s15  ;;  %p1007_p6 = scmp.lt.s32.totalorder %s998_s15, %s998_s15 }
  0x21   : > { %p1001_p10 = pnand %p999_p9, %p987_p13  ;;  %p1008_p4 = por %p1007_p6, %p1006_p2 }
  0x23   : > { %p1002_p1 = pneg %p1001_p10 }
  0x25   : > { %p1009_p8 = pnand %p1008_p4, %p1002_p1 }
  0x27   : > { %1012 = shalt.err (!%p1009_p8)
}
  0x28   : > { %s1135_s16 = smov 64   ;;  %s1136_s17 = smov 4  }
  0x29   : > { %858 = dma.hbm_to_vmem [thread:$0]  (!%p1240_p11), %s1494_s2, 256, %s182_s28, [#allocation7], %s1135_s16, %s1135_s16, %s1136_s17  }
  0x2a   : > { %s1013_s29 = scalar_lea.vmem %s1244_s6, 16  ;;  %p1021_p1 = scmp.lt.s32.totalorder %s1244_s6, %s1244_s6 }
  0x2b   : > { %p1014_p12 = scmp.ne.s32.totalorder %s1244_s6, %s1013_s29  ;;  %p1022_p4 = scmp.lt.s32.totalorder %s1013_s29, %s1013_s29 }
  0x2d   : > { %p1016_p10 = pnand %p1014_p12, %p987_p13  ;;  %p1023_p6 = por %p1022_p4, %p1021_p1 }
  0x2f   : > { %p1017_p2 = pneg %p1016_p10 }
  0x31   : > { %p1024_p8 = pnand %p1023_p6, %p1017_p2 }
  0x33   : > { %1027 = shalt.err (!%p1024_p8)
}
  0x34   : > { %s1137_s30 = smov [#allocation8]   ;;  %s1279_s28 = sadd.s32 1, %s1132_s21  }
  0x35   : > { %861 = dma.vmem_to_smem (!%p1240_p11), %s1244_s6, 16, %s1137_s30, [#allocation5]  }
  0x36   : > { %s30_s8 = sadd.s32 1, %s1128_s20  ;;  %s27_s9 = ssub.s32 %s1132_s21, %s1279_s28 }
  0x37   : > { %p37_p13 = scmp.ne.s32.totalorder %s1128_s20, %s1124_s19  ;;  %p28_p0 = scmp.eq.s32.totalorder %s27_s9, 0 }
  0x38   : > { %p38_p3 = scmp.eq.s32.totalorder %s1132_s21, 0  ;;  %p1505_p5 = scmp.eq.s32.totalorder %s1209_s22, 1 }
  0x39   : > { %p872_p9 = scmp.lt.s32.totalorder %s1132_s21, 2  ;;  %s209_s11 = sand.u32 1, %s1128_s20  }
  0x3a   : > { %p1289_p7 = por %p1505_p5, %p37_p13  ;;  %p39_p12 = por %p38_p3, %p37_p13 }
  0x3b   : > { %s1295_s10 = scalar_select %p28_p0, %s1128_s20, %s30_s8  }
  0x3c   : > { %s792_s12 = sshll.u32 %s209_s11, 2  ;;  %s793_s6 = sshll.u32 %s1132_s21, 6 }
  0x3d   : > { %s1302_s15 = scalar_lea.hbm %s1492_s0, %s793_s6  ;;  %s213_s16 = scalar_lea.vmem [#allocation2], %s792_s12 }
  0x3e   : > { %s220_s17 = sshll.u32 %s213_s16, 4  ;;  %p1306_p11 = pnand %p872_p9, %p39_p12  ;;  %s1304_s17 = int_to_ptr.vmem [resolvable:$true] %s220_s17 }
  0x3f   : > { %s210_s27 = scalar_lea.sflag [#allocation3], %s209_s11  ;;  %s1028_s29 = scalar_lea.hbm %s1302_s15, 64 }
  0x40   : > { %p1029_p10 = scmp.ne.s32.totalorder %s1302_s15, %s1028_s29  ;;  %p1030_p2 = pneg %p1306_p11 }
  0x41   : > { %s1033_s9 = scalar_lea.hbm %s1492_s0, 128  ;;  %p1034_p6 = scmp.lt.u32.totalorder %s1302_s15, %s1492_s0 }
  0x42   : > { %p1031_p1 = pnand %p1030_p2, %p1029_p10  ;;  %p1035_p8 = scmp.lt.u32.totalorder %s1033_s9, %s1028_s29 }
  0x43   : > { %p1037_p0 = scmp.lt.u32.totalorder %s1028_s29, %s1302_s15 }
  0x44   : > { %p1032_p4 = pneg %p1031_p1  ;;  %p1036_p13 = por %p1035_p8, %p1034_p6 }
  0x46   : > { %p1038_p3 = por %p1037_p0, %p1036_p13 }
  0x48   : > { %p1039_p5 = pnand %p1038_p3, %p1032_p4 }
  0x4a   : > { %1042 = shalt.err (!%p1039_p5)
}
  0x4b   : > { %s1043_s11 = scalar_lea.vmem %s1304_s17, 64  ;;  %s1138_s13 = smov [#allocation2]  }
  0x4c   : > { %p1044_p9 = scmp.ne.s32.totalorder %s1304_s17, %s1043_s11  ;;  %s1048_s14 = sshll.u32 %s1138_s13, 4  ;;  %s1049_s14 = int_to_ptr.vmem [resolvable:$false] %s1048_s14 }
  0x4d   : > { %s1050_s16 = scalar_lea.vmem %s1049_s14, 128  ;;  %p1051_p1 = scmp.lt.s32.totalorder %s1304_s17, %s1049_s14 }
  0x4e   : > { %p1046_p12 = pnand %p1044_p9, %p1030_p2  ;;  %p1052_p6 = scmp.lt.s32.totalorder %s1050_s16, %s1043_s11 }
  0x50   : > { %p1047_p10 = pneg %p1046_p12  ;;  %p1053_p8 = por %p1052_p6, %p1051_p1 }
  0x52   : > { %p1054_p13 = pnand %p1053_p8, %p1047_p10 }
  0x54   : > { %1057 = shalt.err (!%p1054_p13)
}
  0x55   : > { %865 = dma.hbm_to_vmem [thread:$0]  (!%p1306_p11), %s1302_s15, 64, %s1304_s17, %s210_s27  }
  0x56   : > { %p1508_p4 = scmp.ne.s32.totalorder %s1503_s26, 0 }
  0x57   : > { %s1338_s29 = sand.u32 (!%p1508_p4), 1, %s1124_s19   ;;  %p1509_p2 = scmp.ne.s32.totalorder (!%p1508_p4), %s1501_s24, 0 }
  0x58   : > { %235 = sbr.rel (%p1508_p4) target bundleno = 954 (0x3ba), region = 40  ;;  %s795_s30 = sshll.u32 (!%p1508_p4), %s1338_s29, 2 }
  0x59   : > { %s238_s8 = scalar_lea.sflag (!%p1508_p4), [#allocation3], %s1338_s29  ;;  %s241_s9 = scalar_lea.vmem (!%p1508_p4), [#allocation2], %s795_s30 }
  0x5f   : > { %1103 = dma.done.wait (%p1509_p2), %s238_s8, 64  }
  0x60   : > { %1105 = vsyncadd (%p1509_p2), %s238_s8, 4294967232  ;;  %p1510_p0 = scmp.eq.s32.totalorder %s1209_s22, 0 }
  0x62   : > { %1107 = dma.done.wait (%p1510_p0), [#allocation7], 256   ;;  %p1511_p11 = pmov %p1510_p0 }
  0x63   : > { %p1512_p3 = pmov %p1510_p0 }
  0x64   : > { %1109 = vsyncadd (%p1511_p11), [#allocation7], 4294967040 }
  0x65   : > { %1111 = dma.done.wait (%p1512_p3), [#allocation5], 16   ;;  %p1513_p5 = pmov %p1510_p0 }
  0x67   : > { %1113 = vsyncadd (%p1513_p5), [#allocation5], 4294967280 }
  0x68   : > { %254 = sfence }
  0x69   : > { %v947_v0 = vld [vmem:[#allocation6] sm:$0xff]   ;;  %v1139_v1 = vmov 0.0   ;;  %v948_v2 = vld [vmem:[#allocation6 + $0x8] sm:$0xff]   ;;  %vm1140_vm0 = vmmov 0   ;;  %v1354_v3 = vld [vmem:[%s241_s9] sm:$0xf]  ;;  %v390_v33 = vlaneseq }
  0x6a   : > { %829 = vmatprep.subr.bf16.mxu0 %v1139_v1  ;;  %837 = vmatprep.subr.bf16.mxu1 %v1139_v1  ;;  %vm308_vm1 = vcmask 261120   ;;  %v1141_v4 = vmov 18   ;;  %v1142_v5 = vmov 16   ;;  %v799_v6 = vld [vmem:[%s1495_s3] ss:$0 sm:$0xff]  ;;  %v1143_v12 = vmov 19  }
  0x6b   : > { %830 = vmatpush3.bf16.msra.mxu0 %v947_v0  ;;  %833 = vmatprep.mubr.msk.bf16.mxu0 %vm1140_vm0, %v1139_v1  ;;  %v1144_v13 = vmov 17   ;;  %v1145_v14 = vmov 20   ;;  %v1146_v15 = vmov 21   ;;  %v1147_v16 = vmov 22   ;;  %p280_p9 = scmp.lt.s32.totalorder %s1209_s22, 1  ;;  %s1375_s15 = sld [smem:[#allocation8]] }
  0x6c   : > { %831 = vmatprep.subr.bf16.mxu0 %v1139_v1  ;;  %839 = vmatprep.mubr.msk.bf16.mxu1 %vm1140_vm0, %v1139_v1  ;;  %v1148_v17 = vmov 24   ;;  %v1149_v18 = vmov 23   ;;  %v1150_v19 = vmov 27   ;;  %v1151_v20 = vmov 25   ;;  %s1380_s17 = sld [smem:[#allocation8 + $0x1]]  ;;  %s1387_s27 = sld [smem:[#allocation8 + $0x2]] }
  0x6d   : > { %932 = vset.pattern.permute.xlu1 %v1141_v4  ;;  %930 = vset.pattern.permute.xlu0 %v1142_v5  ;;  %v1152_v21 = vmov 26   ;;  %v1153_v22 = vmov 28   ;;  %v1154_v23 = vmov 29   ;;  %v1155_v24 = vmov 30   ;;  %s281_s23 = scalar_select %p280_p9, %s1209_s22, 1 }
  0x6e   : > { %v1156_v25 = vmov 31   ;;  %v1361_v36 = vshrl.u32 %v390_v33, 7  ;;  %s1391_s12 = sld [smem:[#allocation8 + $0x3]]  ;;  %s1398_s14 = sld [smem:[#allocation8 + $0x4]]  ;;  %vm618_vm2 = vcmask 64512   ;;  %vm628_vm3 = vcmask 1043456  }
  0x6f   : > { %832 = vmatpush3.bf16.msra.mxu0 %v948_v2  ;;  %s282_s13 = scalar_lea.vmem %s1493_s1, %s281_s23  ;;  %s1402_s16 = sld [smem:[#allocation8 + $0x5]] }
  0x70   : > { %v392_v38 = vsub.s32 0, %v1361_v36  ;;  %v412_v39 = vsub.s32 1, %v1361_v36  ;;  %v426_v40 = vsub.s32 2, %v1361_v36  ;;  %v440_v41 = vsub.s32 3, %v1361_v36  ;;  %s1407_s30 = sld [smem:[#allocation8 + $0x6]]  ;;  %s1413_s8 = sld [smem:[#allocation8 + $0x7]] }
  0x71   : > { %v454_v43 = vsub.s32 4, %v1361_v36  ;;  %v468_v45 = vsub.s32 5, %v1361_v36  ;;  %v482_v50 = vsub.s32 6, %v1361_v36  ;;  %v496_v58 = vsub.s32 7, %v1361_v36  ;;  %s1420_s9 = sld [smem:[#allocation8 + $0x8]]  ;;  %s1426_s24 = sld [smem:[#allocation8 + $0x9]] }
  0x72   : > { %834 = vmatmul.mubr.msk.bf16.vlgmr.msra.gmra.mrb[0].mxu0 %vm308_vm1, %v1354_v3  ;;  %v397_v4 = vstv %s1375_s15  ;;  %s1432_s26 = sld [smem:[#allocation8 + $0xa]]  ;;  %s1435_s15 = sld [smem:[#allocation8 + $0xb]] }
  0x73   : > { %s816_s23 = sld [smem:[#allocation8 + $0xd]]  ;;  %s798_s6 = sshll.u32 %s1338_s29, 3 }
  0x74   : > { %s821_s11 = sshll.u32 %s1209_s22, 7  ;;  %s1157_s22 = smov [#allocation9]  }
 0x145   : > { %v346_v7 = vpop.f32.mrb[0].mxu0 }
 0x146   : > { %v347_v8 = vadd.f32 %v799_v6, %v346_v7  ;;  %v835_v9 = vpop.f32.mrb[1].mxu0 }
 0x147   : > { %v349_v10 = vpop.f32.mrb[2].mxu0  ;;  %v803_v9 = vld [vmem:[%s282_s13] ss:$0 sm:$0xff]  ;;  %s279_s13 = scalar_lea.vmem [#allocation9], %s798_s6 }
 0x148   : > { %421 = vperm.xlu1 %932, %v347_v8   ;;  %387 = vperm.xlu0 %930, %v347_v8   ;;  %v836_v11 = vpop.f32.mrb[3].mxu0 }
 0x14c   : > { %933 = vset.pattern.permute.xlu1 %v1143_v12  ;;  %931 = vset.pattern.permute.xlu0 %v1144_v13 }
 0x14d   : > { %435 = vperm.xlu1 %933, %v347_v8   ;;  %407 = vperm.xlu0 %931, %v347_v8  }
 0x151   : > { %934 = vset.pattern.permute.xlu1 %v1145_v14  ;;  %935 = vset.pattern.permute.xlu0 %v1146_v15 }
 0x152   : > { %449 = vperm.xlu1 %934, %v347_v8   ;;  %463 = vperm.xlu0 %935, %v347_v8  }
 0x156   : > { %936 = vset.pattern.permute.xlu1 %v1147_v16  ;;  %938 = vset.pattern.permute.xlu0 %v1148_v17  ;;  %v431_v16 = vstv %s1387_s27  ;;  %s817_s27 = sld [smem:[#allocation8 + $0xe]] }
 0x157   : > { %477 = vperm.xlu1 %936, %v347_v8   ;;  %505 = vperm.xlu0 %938, %v347_v8  }
 0x15b   : > { %937 = vset.pattern.permute.xlu1 %v1149_v18  ;;  %941 = vset.pattern.permute.xlu0 %v1150_v19 }
 0x15c   : > { %491 = vperm.xlu1 %937, %v347_v8   ;;  %547 = vperm.xlu0 %941, %v347_v8  }
 0x160   : > { %939 = vset.pattern.permute.xlu1 %v1151_v20 }
 0x161   : > { %519 = vperm.xlu1 %939, %v347_v8  }
 0x165   : > { %940 = vset.pattern.permute.xlu1 %v1152_v21 }
 0x166   : > { %533 = vperm.xlu1 %940, %v347_v8  }
 0x16a   : > { %942 = vset.pattern.permute.xlu1 %v1153_v22  ;;  %v445_v22 = vstv %s1391_s12  ;;  %s818_s12 = sld [smem:[#allocation8 + $0xf]] }
 0x16b   : > { %561 = vperm.xlu1 %942, %v347_v8  }
 0x16f   : > { %943 = vset.pattern.permute.xlu1 %v1154_v23 }
 0x170   : > { %575 = vperm.xlu1 %943, %v347_v8  }
 0x174   : > { %944 = vset.pattern.permute.xlu1 %v1155_v24 }
 0x175   : > { %589 = vperm.xlu1 %944, %v347_v8  }
 0x179   : > { %945 = vset.pattern.permute.xlu1 %v1156_v25 }
 0x17a   : > { %603 = vperm.xlu1 %945, %v347_v8   ;;  %352 = vxpose.xlu0.b32.start.end [1/1] (short) (narrow) %v347_v8, 16  ;;  %v417_v8 = vstv %s1380_s17  ;;  %s815_s17 = sld [smem:[#allocation8 + $0xc]] }
 0x1a3   : > { %946 = vset.pattern.permute.xlu0 %v1156_v25 }
 0x1c7   : > { %v422_v26 = vpop.permute.xlu1 %421  ;;  %v388_v27 = vpop.permute.xlu0 %387 }
 0x1cc   : > { %v436_v28 = vpop.permute.xlu1 %435  ;;  %v408_v29 = vpop.permute.xlu0 %407 }
 0x1d1   : > { %v450_v30 = vpop.permute.xlu1 %449  ;;  %v464_v31 = vpop.permute.xlu0 %463 }
 0x1d6   : > { %v478_v32 = vpop.permute.xlu1 %477  ;;  %v506_v34 = vpop.permute.xlu0 %505 }
 0x1db   : > { %v492_v35 = vpop.permute.xlu1 %491  ;;  %v1363_v37 = vpop.permute.xlu0 %547 }
 0x1e0   : > { %v520_v42 = vpop.permute.xlu1 %519 }
 0x1e5   : > { %v534_v55 = vpop.permute.xlu1 %533 }
 0x1ea   : > { %v562_v0 = vpop.permute.xlu1 %561 }
 0x1ef   : > { %v576_v13 = vpop.permute.xlu1 %575 }
 0x1fa   : > { %v368_v44 = vpop.trf.xlu0 }
 0x1fb   : > { %v393_v46 = vrot.slane %v368_v44, %v392_v38  ;;  %v413_v47 = vrot.slane %v368_v44, %v412_v39  ;;  %v427_v48 = vrot.slane %v368_v44, %v426_v40  ;;  %v441_v49 = vrot.slane %v368_v44, %v440_v41 }
 0x1fc   : > { %v455_v54 = vrot.slane %v368_v44, %v454_v43  ;;  %v469_v57 = vrot.slane %v368_v44, %v468_v45  ;;  %v483_v60 = vrot.slane %v368_v44, %v482_v50  ;;  %v497_v63 = vrot.slane %v368_v44, %v496_v58 }
 0x1fd   : > { %v394_v51 = vadd.f32 %v393_v46, %v388_v27  ;;  %v414_v52 = vadd.f32 %v413_v47, %v408_v29  ;;  %v428_v53 = vadd.f32 %v427_v48, %v422_v26  ;;  %v442_v56 = vadd.f32 %v441_v49, %v436_v28 }
 0x1fe   : > { %v456_v59 = vadd.f32 %v455_v54, %v450_v30  ;;  %v1384_v61 = vpop.trf.xlu0  ;;  %v470_v62 = vadd.f32 %v469_v57, %v464_v31  ;;  %v484_v1 = vadd.f32 %v483_v60, %v478_v32  ;;  %v498_v5 = vadd.f32 %v497_v63, %v492_v35  ;;  %v590_v31 = vpop.permute.xlu1 %589 }
 0x1ff   : > { %949 = vtanh.f32 %v394_v51  ;;  %v511_v2 = vrot.slane %v1384_v61, %v392_v38  ;;  %v525_v6 = vrot.slane %v1384_v61, %v412_v39  ;;  %v539_v11 = vrot.slane %v1384_v61, %v426_v40 }
 0x200   : > { %951 = vtanh.f32 %v414_v52  ;;  %v553_v18 = vrot.slane %v1384_v61, %v440_v41  ;;  %v567_v24 = vrot.slane %v1384_v61, %v454_v43  ;;  %v459_v28 = vstv %s1398_s14  ;;  %s686_s14 = sshll.u32 %s279_s13, 4  ;;  %s1449_s14 = int_to_ptr.vmem [resolvable:$true] %s686_s14 }
 0x201   : > { %953 = vtanh.f32 %v428_v53  ;;  %v512_v10 = vadd.f32 %v511_v2, %v506_v34  ;;  %v526_v17 = vadd.f32 %v525_v6, %v520_v42  ;;  %v540_v23 = vadd.f32 %v539_v11, %v534_v55 }
 0x202   : > { %955 = vtanh.f32 %v442_v56  ;;  %v554_v29 = vadd.f32 %v553_v18, %v1363_v37  ;;  %v581_v30 = vrot.slane %v1384_v61, %v468_v45  ;;  %v473_v35 = vstv %s1402_s16 }
 0x203   : > { %957 = vtanh.f32 %v456_v59  ;;  %v568_v38 = vadd.f32 %v567_v24, %v562_v0  ;;  %v595_v39 = vrot.slane %v1384_v61, %v482_v50  ;;  %v609_v43 = vrot.slane %v1384_v61, %v496_v58  ;;  %v604_v50 = vpop.permute.xlu1 %603 }
 0x204   : > { %959 = vtanh.f32 %v470_v62  ;;  %v582_v42 = vadd.f32 %v581_v30, %v576_v13  ;;  %v487_v44 = vstv %s1407_s30  ;;  %v501_v49 = vstv %s1413_s8  ;;  %s1447_s8 = scalar_lea.hbm %s1497_s5, %s821_s11 }
 0x205   : > { %961 = vtanh.f32 %v484_v1  ;;  %v596_v48 = vadd.f32 %v595_v39, %v590_v31  ;;  %v610_v53 = vadd.f32 %v609_v43, %v604_v50  ;;  %v515_v54 = vstv %s1420_s9  ;;  %s673_s9 = scalar_lea.sflag [#allocation4], %s1338_s29 }
 0x206   : > { %963 = vtanh.f32 %v498_v5  ;;  %v529_v58 = vstv %s1426_s24  ;;  %v543_v62 = vstv %s1432_s26  ;;  %v557_v2 = vstv %s1435_s15  ;;  %s1058_s24 = scalar_lea.vmem %s1449_s14, 128  ;;  %s1062_s26 = sshll.u32 %s1157_s22, 4  ;;  %s1063_s26 = int_to_ptr.vmem [resolvable:$false] %s1062_s26 }
 0x207   : > { %965 = vtanh.f32 %v512_v10  ;;  %v585_v11 = vstv %s816_s23  ;;  %p1059_p12 = scmp.ne.s32.totalorder %s1449_s14, %s1058_s24  ;;  %s1064_s15 = scalar_lea.vmem %s1063_s26, 256 }
 0x208   : > { %967 = vtanh.f32 %v526_v17  ;;  %p1065_p6 = scmp.lt.s32.totalorder %s1449_s14, %s1063_s26  ;;  %p1066_p8 = scmp.lt.s32.totalorder %s1064_s15, %s1058_s24 }
 0x209   : > { %v950_v7 = vpop.eup %949  ;;  %969 = vtanh.f32 %v540_v23  ;;  %p1060_p10 = pnand %p1059_p12, %p1289_p7 }
 0x20a   : > { %v952_v12 = vpop.eup %951  ;;  %v398_v14 = vmul.f32 %v950_v7, %v397_v4  ;;  %971 = vtanh.f32 %v554_v29  ;;  %v571_v7 = vstv %s815_s17  ;;  %p1067_p13 = por %p1066_p8, %p1065_p6 }
 0x20b   : > { %v954_v15 = vpop.eup %953  ;;  %v418_v19 = vmul.f32 %v952_v12, %v417_v8  ;;  %973 = vtanh.f32 %v568_v38  ;;  %p1061_p1 = pneg %p1060_p10 }
 0x20c   : > { %v405_v20 = vadd.f32 %v803_v9, %v398_v14  ;;  %v956_v21 = vpop.eup %955  ;;  %v432_v25 = vmul.f32 %v954_v15, %v431_v16  ;;  %975 = vtanh.f32 %v582_v42  ;;  %v599_v15 = vstv %s817_s27 }
 0x20d   : > { %v958_v27 = vpop.eup %957  ;;  %v446_v32 = vmul.f32 %v956_v21, %v445_v22  ;;  %977 = vtanh.f32 %v596_v48  ;;  %p1068_p4 = pnand %p1067_p13, %p1061_p1 }
 0x20e   : > { %v419_v26 = vadd.f32 %v418_v19, %v405_v20  ;;  %v960_v34 = vpop.eup %959  ;;  %v460_v37 = vmul.f32 %v958_v27, %v459_v28  ;;  %979 = vtanh.f32 %v610_v53  ;;  %v613_v19 = vstv %s818_s12 }
 0x20f   : > { %v962_v41 = vpop.eup %961  ;;  %v474_v45 = vmul.f32 %v960_v34, %v473_v35  ;;  %v629_v28 = vsel %vm628_vm3, %v1354_v3, 0 }
 0x210   : > { %v433_v33 = vadd.f32 %v432_v25, %v419_v26  ;;  %v964_v47 = vpop.eup %963  ;;  %v488_v52 = vmul.f32 %v962_v41, %v487_v44  ;;  %838 = vmatpush3.bf16.msra.mxu1 %v629_v28 }
 0x211   : > { %v966_v36 = vpop.eup %965  ;;  %v502_v56 = vmul.f32 %v964_v47, %v501_v49 }
 0x212   : > { %v447_v40 = vadd.f32 %v446_v32, %v433_v33  ;;  %v968_v57 = vpop.eup %967  ;;  %v516_v60 = vmul.f32 %v966_v36, %v515_v54 }
 0x213   : > { %v970_v61 = vpop.eup %969  ;;  %v530_v0 = vmul.f32 %v968_v57, %v529_v58 }
 0x214   : > { %v461_v46 = vadd.f32 %v460_v37, %v447_v40  ;;  %v972_v1 = vpop.eup %971  ;;  %v544_v5 = vmul.f32 %v970_v61, %v543_v62 }
 0x215   : > { %v974_v6 = vpop.eup %973  ;;  %v558_v9 = vmul.f32 %v972_v1, %v557_v2 }
 0x216   : > { %v475_v51 = vadd.f32 %v474_v45, %v461_v46  ;;  %v976_v10 = vpop.eup %975  ;;  %v572_v13 = vmul.f32 %v974_v6, %v571_v7 }
 0x217   : > { %v978_v14 = vpop.eup %977  ;;  %v586_v17 = vmul.f32 %v976_v10, %v585_v11 }
 0x218   : > { %v489_v55 = vadd.f32 %v488_v52, %v475_v51  ;;  %v980_v18 = vpop.eup %979  ;;  %v600_v21 = vmul.f32 %v978_v14, %v599_v15 }
 0x219   : > { %v614_v23 = vmul.f32 %v980_v18, %v613_v19 }
 0x21a   : > { %v503_v59 = vadd.f32 %v502_v56, %v489_v55 }
 0x21c   : > { %v517_v63 = vadd.f32 %v516_v60, %v503_v59 }
 0x21e   : > { %v531_v4 = vadd.f32 %v530_v0, %v517_v63 }
 0x220   : > { %v545_v8 = vadd.f32 %v544_v5, %v531_v4 }
 0x222   : > { %v559_v12 = vadd.f32 %v558_v9, %v545_v8 }
 0x224   : > { %v573_v16 = vadd.f32 %v572_v13, %v559_v12 }
 0x226   : > { %v587_v20 = vadd.f32 %v586_v17, %v573_v16 }
 0x228   : > { %v601_v22 = vadd.f32 %v600_v21, %v587_v20 }
 0x22a   : > { %v615_v24 = vadd.f32 %v614_v23, %v601_v22 }
 0x22c   : > { %v616_v25 = vmul.f32 1.442695, %v615_v24 }
 0x22e   : > { %981 = vpow2.f32 %v616_v25 }
 0x238   : > { %v982_v26 = vpop.eup %981 }
 0x239   : > { %v619_v27 = vsel %vm618_vm2, %v982_v26, 0.0 }
 0x23a   : > { %620 = vadd.xlane.f32.xlu1 %v619_v27 }
 0x2c7   : > { %v621_v29 = vpop.xlane.xlu1 %620 }
 0x2c8   : > { %983 = vrcp.f32 %v621_v29 }
 0x2d2   : > { %v984_v30 = vpop.eup %983 }
 0x2d3   : > { %v623_v31 = vmul.f32 %v984_v30, %v982_v26 }
 0x2d5   : > { %v624_v32 = vpack.c.bf16 %v623_v31, %v623_v31 }
 0x2d7   : > { %840 = vmatmul.mubr.msk.bf16.vlgmr.msra.gmra.mrb[0].mxu1 %vm618_vm2, %v624_v32 }
 0x3aa   : > { %v665_v3 = vpop.f32.mrb[0].mxu1 }
 0x3ab   : > { %671 = vst.msk [vmem:[%s279_s13] sm:$0xff] %vm308_vm1, %v665_v3  ;;  %v841_v33 = vpop.f32.mrb[1].mxu1 }
 0x3ac   : > { %v668_v34 = vpop.f32.mrb[2].mxu1 }
 0x3ad   : > { %1071 = shalt.err (!%p1068_p4)
}
 0x3ae   : > { %s1072_s29 = scalar_lea.hbm %s1447_s8, 128  ;;  %s1076_s27 = scalar_lea.hbm %s1497_s5, 256 }
 0x3af   : > { %p1073_p2 = scmp.ne.s32.totalorder %s1447_s8, %s1072_s29  ;;  %p1077_p3 = scmp.lt.u32.totalorder %s1447_s8, %s1497_s5 }
 0x3b0   : > { %p1078_p5 = scmp.lt.u32.totalorder %s1076_s27, %s1072_s29  ;;  %p1080_p12 = scmp.lt.u32.totalorder %s1072_s29, %s1447_s8 }
 0x3b1   : > { %p1074_p0 = pnand %p1073_p2, %p1289_p7 }
 0x3b2   : > { %p1079_p9 = por %p1078_p5, %p1077_p3 }
 0x3b3   : > { %p1075_p11 = pneg %p1074_p0 }
 0x3b4   : > { %p1081_p10 = por %p1080_p12, %p1079_p9 }
 0x3b6   : > { %p1082_p1 = pnand %p1081_p10, %p1075_p11 }
 0x3b8   : > { %1085 = shalt.err (!%p1082_p1)
}
 0x3b9   : > { %853 = dma.vmem_to_hbm [thread:$0]  (%p1289_p7), %s1449_s14, 128, %s1447_s8, %s673_s9   ;;  %v842_v35 = vpop.f32.mrb[3].mxu1 }
 0x3ba PF: > { %s698_s11 = sand.u32 1, %s1120_s18   ;;  %p1514_p6 = scmp.ne.s32.totalorder %s1502_s25, 0 }
 0x3bb   : > { %p1515_p8 = scmp.ge.s32.totalorder %s1132_s21, 2  ;;  %s699_s13 = scalar_lea.sflag [#allocation4], %s698_s11 }
 0x3bd   : > { %p867_p13 = pnand %p1515_p8, %p1514_p6 }
 0x3bf   : > { %1115 = dma.done.wait (!%p867_p13), %s699_s13, 128  }
 0x3c0   : > { %1117 = vsyncadd (!%p867_p13), %s699_s13, 4294967168  ;;  %p20_p4 = scmp.ge.s32.totalorder %s1279_s28, 4   ;;  %s1516_s18 = smov %s1124_s19 }
 0x3c1   : > { %s1517_s19 = smov %s1128_s20  ;;  %s1518_s20 = smov %s1295_s10 }
 0x3c2   : > { %s1519_s21 = smov %s1279_s28  ;;  %22 = sbr.rel (!%p20_p4) target bundleno = 7 (0x7), region = 97 }
 0x3c9   :  { %704 = vsyncpa [#allocation3], 1 }
 0x3ca   :  { %706 = vsyncpa [#allocation3 + $0x1], 1 }
 0x3cb   :  { %707 = vsyncpa [#allocation7], 1 }
 0x3cc   :  { %708 = vsyncpa [#allocation4], 1 }
 0x3cd   :  { %710 = vsyncpa [#allocation4 + $0x1], 1 }
 0x3ce   :  { %711 = vsyncpa [#allocation5], 1 }
 0x3cf   :  { %713 = vsyncpa [#allocation5 + $0x1], 1 }

</bundles_post_ra>
